<compile_context>
chip_gen: v5e
topology: v5e:2x2
jax: 0.10.0
libtpu: 0.0.40
codegen_flags: <defaults>
</compile_context>

<pallas_src>
import jax
import jax.numpy as jnp
from jax.experimental import pallas as pl
from jax.experimental.pallas import tpu as pltpu

INPUT_SIZE = 10
HIDDEN = 12
NUM_CLASSES = 7
OUT_PAD = 128            # lane-dense output slab width (1 vreg of lanes)
LEAKY_SLOPE = 0.01       # PyTorch F.leaky_relu default negative slope


def _round_up(n, m):
    return ((n + m - 1) // m) * m


def _mlp_kernel(x_ref, w1_ref, b1_ref, w2_ref, b2_ref, o_ref):
    # fc1: (TB, 10) @ (10, 12), f32 accumulation on the MXU.
    h = jnp.dot(x_ref[...], w1_ref[...], preferred_element_type=jnp.float32)
    # Bias add + leaky_relu in f32 (v5e has no bf16 elementwise path).
    h = h + b1_ref[...]
    h = jnp.where(h >= 0, h, LEAKY_SLOPE * h)
    # fc3: (TB, 12) @ (12, 128) -> lane-dense (TB, 128) output block.
    h = h.astype(w2_ref.dtype)
    out = jnp.dot(h, w2_ref[...], preferred_element_type=jnp.float32)
    out = out + b2_ref[...]
    o_ref[...] = out.astype(o_ref.dtype)


def net_forward(x, w1, b1, w2, b2, *, compute_dtype=jnp.float32, block_rows=1024):
    """Pallas forward pass for Net.

    x:  (B, 10)
    w1: (10, 12), b1: (12,)
    w2: (12, 7),  b2: (7,)
    returns (B, 7) float32

    compute_dtype: jnp.float32 (exact) or jnp.bfloat16 (half HBM traffic on the
                   x stream; recommended on v6e/v7x).
    block_rows:    batch tile cap; 512-2048 reaches ~85% of HBM roofline, and
                   1024 keeps the double-buffered footprint ~2 MiB (v7x-safe).
    """
    B = x.shape[0]

    # --- wrapper-side layout prep (one-time, tiny) ------------------------------
    # Biases as (1, N) f32; fc3 weight/bias zero-padded to 128 output lanes so the
    # kernel's output store is unmasked / lane-dense.
    b1_2d = b1.astype(jnp.float32).reshape(1, HIDDEN)
    w2_p = (
        jnp.zeros((HIDDEN, OUT_PAD), dtype=compute_dtype)
        .at[:, :NUM_CLASSES]
        .set(w2.astype(compute_dtype))
    )
    b2_p = (
        jnp.zeros((1, OUT_PAD), dtype=jnp.float32)
        .at[0, :NUM_CLASSES]
        .set(b2.astype(jnp.float32))
    )

    x_c = x.astype(compute_dtype)
    w1_c = w1.astype(compute_dtype)

    # --- batch tiling: TB multiple of 8, pad ragged batches ---------------------
    TB = block_rows if B >= block_rows else _round_up(B, 8)
    B_pad = _round_up(B, TB)
    if B_pad != B:
        x_c = jnp.pad(x_c, ((0, B_pad - B), (0, 0)))
    grid = (B_pad // TB,)

    itemsize = jnp.dtype(compute_dtype).itemsize
    cost = pl.CostEstimate(
        flops=2 * B_pad * (INPUT_SIZE * HIDDEN + HIDDEN * NUM_CLASSES),
        transcendentals=0,
        bytes_accessed=(
            B_pad * (INPUT_SIZE * itemsize + OUT_PAD * 4)           # x in, out slab
            + (INPUT_SIZE * HIDDEN + HIDDEN * OUT_PAD) * itemsize   # weights
            + (HIDDEN + OUT_PAD) * 4                                # biases
        ),
    )

    out_padded = pl.pallas_call(
        _mlp_kernel,
        out_shape=jax.ShapeDtypeStruct((B_pad, OUT_PAD), jnp.float32),
        grid=grid,
        in_specs=[
            pl.BlockSpec((TB, INPUT_SIZE), lambda i: (i, 0)),
            pl.BlockSpec((INPUT_SIZE, HIDDEN), lambda i: (0, 0)),
            pl.BlockSpec((1, HIDDEN), lambda i: (0, 0)),
            pl.BlockSpec((HIDDEN, OUT_PAD), lambda i: (0, 0)),
            pl.BlockSpec((1, OUT_PAD), lambda i: (0, 0)),
        ],
        out_specs=pl.BlockSpec((TB, OUT_PAD), lambda i: (i, 0)),
        compiler_params=pltpu.CompilerParams(
            dimension_semantics=("parallel",),   # shard batch blocks across v7x's 2 TCs
        ),
        cost_estimate=cost,
    )(x_c, w1_c, b1_2d, w2_p, b2_p)

    # Drop lane padding and batch padding.
    return out_padded[:B, :NUM_CLASSES]


def net_reference(x, w1, b1, w2, b2):
    """Plain-JAX reference, same math as the PyTorch forward (f32)."""
    h = x @ w1 + b1
    h = jnp.where(h >= 0, h, LEAKY_SLOPE * h)
    return h @ w2 + b2


def init_params(key):
    """Deterministic init mimicking PyTorch's default Linear init:
    U(-1/sqrt(fan_in), 1/sqrt(fan_in)) for both weight and bias."""
    k1, k2, k3, k4 = jax.random.split(key, 4)
    bound1 = 1.0 / jnp.sqrt(INPUT_SIZE)
    bound2 = 1.0 / jnp.sqrt(HIDDEN)
    w1 = jax.random.uniform(k1, (INPUT_SIZE, HIDDEN), jnp.float32, -bound1, bound1)
    b1 = jax.random.uniform(k2, (HIDDEN,), jnp.float32, -bound1, bound1)
    w2 = jax.random.uniform(k3, (HIDDEN, NUM_CLASSES), jnp.float32, -bound2, bound2)
    b2 = jax.random.uniform(k4, (NUM_CLASSES,), jnp.float32, -bound2, bound2)
    return w1, b1, w2, b2


if __name__ == "__main__":
    key = jax.random.PRNGKey(0)
    k_params, k_x1, k_x2 = jax.random.split(key, 3)
    w1, b1, w2, b2 = init_params(k_params)

    # --- 1) small batch, f32 path, single block ---------------------------------
    batch = 8
    x = jax.random.normal(k_x1, (batch, INPUT_SIZE), jnp.float32)
    out = jax.block_until_ready(net_forward(x, w1, b1, w2, b2))
    ref = net_reference(x, w1, b1, w2, b2)
    assert out.shape == (batch, NUM_CLASSES)
    assert jnp.allclose(out, ref, atol=1e-5, rtol=1e-5)

    # --- 2) ragged batch with a multi-block grid (exercises padding + pipeline) --
    batch2 = 50
    x2 = jax.random.normal(k_x2, (batch2, INPUT_SIZE), jnp.float32)
    out2 = jax.block_until_ready(net_forward(x2, w1, b1, w2, b2, block_rows=16))
    ref2 = net_reference(x2, w1, b1, w2, b2)
    assert out2.shape == (batch2, NUM_CLASSES)
    assert jnp.allclose(out2, ref2, atol=1e-5, rtol=1e-5)

    # --- 3) bf16 compute path (v6e/v7x HBM-traffic optimization), looser check ---
    out3 = jax.block_until_ready(
        net_forward(x, w1, b1, w2, b2, compute_dtype=jnp.bfloat16)
    )
    assert out3.shape == (batch, NUM_CLASSES)
    assert jnp.allclose(out3, ref, atol=5e-2, rtol=5e-2)

    print("KERNEL_OK")
</pallas_src>

<mosaic_0001>
module attributes {stable_mosaic.version = 11 : i64} {
  func.func @_mlp_kernel(%arg0: i32, %arg1: memref<8x10xf32, #tpu.memory_space<vmem>>, %arg2: memref<10x12xf32, #tpu.memory_space<vmem>>, %arg3: memref<1x12xf32, #tpu.memory_space<vmem>>, %arg4: memref<12x128xf32, #tpu.memory_space<vmem>>, %arg5: memref<1x128xf32, #tpu.memory_space<vmem>>, %arg6: memref<8x128xf32, #tpu.memory_space<vmem>>) attributes {dimension_semantics = [#tpu.dimension_semantics<parallel>], iteration_bounds = array<i64: 1>, scalar_prefetch = 0 : i64, scratch_operands = 0 : i64, tpu.core_type = #tpu.core_type<tc>, window_params = [{transform_indices = @transform_0, window_bounds = array<i64: 8, 10>}, {pipeline_mode = #tpu.pipeline_mode<synchronous>, transform_indices = @transform_1, window_bounds = array<i64: 10, 12>}, {pipeline_mode = #tpu.pipeline_mode<synchronous>, transform_indices = @transform_2, window_bounds = array<i64: 1, 12>}, {pipeline_mode = #tpu.pipeline_mode<synchronous>, transform_indices = @transform_3, window_bounds = array<i64: 12, 128>}, {pipeline_mode = #tpu.pipeline_mode<synchronous>, transform_indices = @transform_4, window_bounds = array<i64: 1, 128>}, {transform_indices = @transform_5, window_bounds = array<i64: 8, 128>}]} {
    %c0 = arith.constant 0 : index
    %c0_0 = arith.constant 0 : index
    %0 = vector.load %arg1[%c0, %c0_0] : memref<8x10xf32, #tpu.memory_space<vmem>>, vector<8x10xf32>
    %c0_1 = arith.constant 0 : index
    %c0_2 = arith.constant 0 : index
    %1 = vector.load %arg2[%c0_1, %c0_2] : memref<10x12xf32, #tpu.memory_space<vmem>>, vector<10x12xf32>
    %cst = arith.constant dense<0.000000e+00> : vector<8x12xf32>
    %2 = tpu.matmul %0, %1, %cst {dimension_numbers = #tpu.dot_dimension_numbers<[1], [0], [0], [1], [0, 0, 1, 1], [], []>} : vector<8x10xf32>, vector<10x12xf32>, vector<8x12xf32> -> vector<8x12xf32>
    %c0_3 = arith.constant 0 : index
    %c0_4 = arith.constant 0 : index
    %3 = vector.load %arg3[%c0_3, %c0_4] : memref<1x12xf32, #tpu.memory_space<vmem>>, vector<1x12xf32>
    %4 = vector.broadcast %3 : vector<1x12xf32> to vector<8x12xf32>
    %5 = arith.addf %2, %4 : vector<8x12xf32>
    %cst_5 = arith.constant 0.000000e+00 : f32
    %6 = vector.broadcast %cst_5 : f32 to vector<8x12xf32>
    %7 = arith.cmpf oge, %5, %6 : vector<8x12xf32>
    %cst_6 = arith.constant 0.00999999977 : f32
    %8 = vector.broadcast %cst_6 : f32 to vector<8x12xf32>
    %9 = arith.mulf %8, %5 : vector<8x12xf32>
    %10 = arith.select %7, %5, %9 : vector<8x12xi1>, vector<8x12xf32>
    %c0_7 = arith.constant 0 : index
    %c0_8 = arith.constant 0 : index
    %11 = vector.load %arg4[%c0_7, %c0_8] : memref<12x128xf32, #tpu.memory_space<vmem>>, vector<12x128xf32>
    %cst_9 = arith.constant dense<0.000000e+00> : vector<8x128xf32>
    %12 = tpu.matmul %10, %11, %cst_9 {dimension_numbers = #tpu.dot_dimension_numbers<[1], [0], [0], [1], [0, 0, 1, 1], [], []>} : vector<8x12xf32>, vector<12x128xf32>, vector<8x128xf32> -> vector<8x128xf32>
    %c0_10 = arith.constant 0 : index
    %c0_11 = arith.constant 0 : index
    %13 = vector.load %arg5[%c0_10, %c0_11] : memref<1x128xf32, #tpu.memory_space<vmem>>, vector<1x128xf32>
    %14 = vector.broadcast %13 : vector<1x128xf32> to vector<8x128xf32>
    %15 = arith.addf %12, %14 : vector<8x128xf32>
    %c0_12 = arith.constant 0 : index
    %c0_13 = arith.constant 0 : index
    %16 = vector.load %arg6[%c0_12, %c0_13] : memref<8x128xf32, #tpu.memory_space<vmem>>, vector<8x128xf32>
    tpu.vector_store %arg6[%c0_12, %c0_13], %15 {strides = array<i32>} : memref<8x128xf32, #tpu.memory_space<vmem>>, vector<8x128xf32>,
    return
  }
  func.func @transform_0(%arg0: i32) -> (i32, i32) {
    %c0_i32 = arith.constant 0 : i32
    %c0_i32_0 = arith.constant 0 : i32
    return %arg0, %c0_i32 : i32, i32
  }
  func.func @transform_1(%arg0: i32) -> (i32, i32) {
    %c0_i32 = arith.constant 0 : i32
    %c0_i32_0 = arith.constant 0 : i32
    %c0_i32_1 = arith.constant 0 : i32
    return %c0_i32, %c0_i32_0 : i32, i32
  }
  func.func @transform_2(%arg0: i32) -> (i32, i32) {
    %c0_i32 = arith.constant 0 : i32
    %c0_i32_0 = arith.constant 0 : i32
    %c0_i32_1 = arith.constant 0 : i32
    return %c0_i32, %c0_i32_0 : i32, i32
  }
  func.func @transform_3(%arg0: i32) -> (i32, i32) {
    %c0_i32 = arith.constant 0 : i32
    %c0_i32_0 = arith.constant 0 : i32
    %c0_i32_1 = arith.constant 0 : i32
    return %c0_i32, %c0_i32_0 : i32, i32
  }
  func.func @transform_4(%arg0: i32) -> (i32, i32) {
    %c0_i32 = arith.constant 0 : i32
    %c0_i32_0 = arith.constant 0 : i32
    %c0_i32_1 = arith.constant 0 : i32
    return %c0_i32, %c0_i32_0 : i32, i32
  }
  func.func @transform_5(%arg0: i32) -> (i32, i32) {
    %c0_i32 = arith.constant 0 : i32
    %c0_i32_0 = arith.constant 0 : i32
    return %arg0, %c0_i32 : i32, i32
  }
}

</mosaic_0001>

<bundles_post_ra>
// kernel: tpu_custom_call.1
= control target key start
LH: loop header
LB: loop body
LE: loop exit
PB: predicated region body
PF: predicated region fallthrough
CT: control target
= control target key end

     0   :  { %10 = vsyncpa [#allocation3], 0  ;;  %s325_s0 = inlined_call_operand.hbm [shape: f32[8,10], index: 0, kind: input, shape index: {}]   ;;  %s326_s1 = inlined_call_operand.hbm [shape: f32[10,12], index: 1, kind: input, shape index: {}]   ;;  %s327_s2 = inlined_call_operand.vmem [shape: f32[1,12], index: 2, kind: input, shape index: {}]   ;;  %s328_s3 = inlined_call_operand.hbm [shape: f32[12,128], index: 3, kind: input, shape index: {}]   ;;  %s329_s4 = inlined_call_operand.vmem [shape: f32[1,128], index: 4, kind: input, shape index: {}]   ;;  %s330_s5 = inlined_call_operand.hbm [shape: f32[8,128], index: 5, kind: output, shape index: {}]  }
   0x1   :  { %11 = vsyncpa [#allocation6], 0  ;;  %s28_s20 = sshll.u32 %s326_s1, 4  ;;  %s29_s20 = int_to_ptr.hbm [resolvable:$true] %s28_s20 }
   0x2   :  { %12 = vsyncpa [#allocation4], 0  ;;  %s271_s21 = smov [#allocation5]   ;;  %s18_s25 = sshll.u32 %s325_s0, 4  ;;  %s19_s25 = int_to_ptr.hbm [resolvable:$true] %s18_s25 }
   0x3   :  { %s30_s22 = sshll.u32 %s271_s21, 4  ;;  %s272_s26 = smov 128   ;;  %s31_s22 = int_to_ptr.vmem [resolvable:$true] %s30_s22 }
   0x4   :  { %s273_s27 = smov 8   ;;  %s274_s28 = smov [#allocation2]  }
   0x5   :  { %36 = dma.hbm_to_vmem [thread:$0]  %s29_s20, 256, %s31_s22, [#allocation6], %s272_s26, %s272_s26, %s273_s27  }
   0x6   :  { %s20_s29 = sshll.u32 %s274_s28, 4  ;;  %s43_s7 = sshll.u32 %s328_s3, 4  ;;  %s21_s29 = int_to_ptr.vmem [resolvable:$true] %s20_s29  ;;  %s44_s7 = int_to_ptr.hbm [resolvable:$true] %s43_s7 }
   0x7   :  { %23 = dma.hbm_to_vmem [thread:$0]  %s19_s25, 128, %s21_s29, [#allocation3]  }
   0x8   :  { %s275_s1 = smov [#allocation7]  }
   0x9   :  { %s45_s8 = sshll.u32 %s275_s1, 4  ;;  %s46_s8 = int_to_ptr.vmem [resolvable:$true] %s45_s8 }
   0xa   :  { %51 = dma.hbm_to_vmem [thread:$0]  %s44_s7, 256, %s46_s8, [#allocation6], %s272_s26, %s272_s26, %s273_s27  }
   0xb   :  { %265 = dma.done.wait [#allocation3], 128  }
   0xc   :  { %266 = vsyncadd [#allocation3], 4294967168 }
   0xd   :  { %267 = dma.done.wait [#allocation6], 512  }
   0xe   :  { %268 = vsyncadd [#allocation6], 4294966784  ;;  %vm77_vm0 = vcmask 1041408   ;;  %v68_v0 = vld [vmem:[#allocation5 + $0x8] sm:$0x3]  ;;  %v67_v1 = vld [vmem:[#allocation5] sm:$0xff] }
   0xf   :  { %157 = vmatpush.msk.msra.mxu0 %vm77_vm0, %v68_v0  ;;  %v66_v2 = vld [vmem:[#allocation2] sm:$0xff]  ;;  %vm73_vm1 = vcmask 80896   ;;  %vm114_vm2 = vcmask 1043456   ;;  %v104_v4 = vld [vmem:[#allocation7] sm:$0xff]  ;;  %vm110_vm4 = vcmask 97280   ;;  %s276_s11 = smov [#allocation8]  }
  0x10   :  { %v105_v3 = vld [vmem:[#allocation7 + $0x8] sm:$0xf]  ;;  %s144_s12 = sshll.u32 %s276_s11, 4  ;;  %s146_s15 = sshll.u32 %s330_s5, 4  ;;  %s145_s12 = int_to_ptr.vmem [resolvable:$true] %s144_s12  ;;  %s147_s15 = int_to_ptr.hbm [resolvable:$true] %s146_s15 }
  0x11   :  { %96 = vmatpush.msra.mxu0 %v67_v1  ;;  %159 = vmatpush.msk.msra.mxu1 %vm114_vm2, %v105_v3  ;;  %v167_v5 = vld [vmem:[%s327_s2] ss:$0 sm:$0xff] }
  0x12   :  { %158 = vmatmul.msk.f32.vlgmr.msra.gmra.mxu0 %vm73_vm1, %v66_v2  ;;  %v168_v10 = vld [vmem:[%s329_s4] ss:$0 sm:$0xff] }
  0x13   :  { %133 = vmatpush.msra.mxu1 %v104_v4 }
  0x8f   :  { %v98_v6 = vpop.f32.mrf.mxu0 }
  0x90   :  { %v99_v7 = vadd.f32 %v167_v5, %v98_v6 }
  0x92   :  { %v102_v8 = vmul.f32 0.01, %v99_v7  ;;  %vm101_vm3 = vcmp.ge.f32.partialorder %v99_v7, 0.0 }
  0x94   :  { %v103_v9 = vsel %vm101_vm3, %v99_v7, %v102_v8 }
  0x95   :  { %160 = vmatmul.msk.f32.vlgmr.msra.gmra.mxu1 %vm110_vm4, %v103_v9 }
 0x112   :  { %v135_v11 = vpop.f32.mrf.mxu1 }
 0x113   :  { %v136_v12 = vadd.f32 %v168_v10, %v135_v11 }
 0x115   :  { %138 = vst [vmem:[#allocation8] sm:$0xff] %v136_v12 }
 0x116   :  { %149 = dma.vmem_to_hbm [thread:$0]  %s145_s12, 128, %s147_s15, [#allocation4]  }
 0x117   :  { %269 = dma.done.wait [#allocation4], 128  }
 0x118   :  { %270 = vsyncadd [#allocation4], 4294967168 }
 0x119   :  { %154 = vsyncpa [#allocation3], 1 }
 0x11a   :  { %155 = vsyncpa [#allocation6], 1 }
 0x11b   :  { %156 = vsyncpa [#allocation4], 1 }

</bundles_post_ra>
